<compile_context>
chip_gen: v7x
topology: tpu7x:2x2x1
jax: 0.10.0
libtpu: 0.0.40
codegen_flags: <defaults>
</compile_context>

<pallas_src>
import numpy as np
import jax
import jax.numpy as jnp
from jax import lax
from jax.experimental import pallas as pl
from jax.experimental.pallas import tpu as pltpu


def _gaussian_1d(kernel_size: int) -> np.ndarray:
    # Matches the torch __init__ exactly (deterministic, no checkpoint needed).
    coords = np.arange(kernel_size, dtype=np.float64) - kernel_size // 2
    g = np.exp(-(coords ** 2) / (2.0 * (kernel_size / 6.0) ** 2))
    g = g / g.sum()
    return g.astype(np.float32)


def _band_matrix(n: int, g: np.ndarray) -> np.ndarray:
    """(n, n) banded matrix M with M[i, i + d - P] = g[d].

    (M @ x) along an axis of length n equals the 1-D convolution of x with g under
    zero padding of P = K // 2 (boundary rows are truncated, NOT renormalized, to
    match F.conv2d(padding=P) semantics exactly).
    """
    K = len(g)
    P = K // 2
    M = np.zeros((n, n), dtype=np.float32)
    for i in range(n):
        for d in range(K):
            u = i + d - P
            if 0 <= u < n:
                M[i, u] = g[d]
    return M


def local_contrast_normalization(img: jax.Array,
                                 kernel_size: int = 9,
                                 epsilon: float = 1e-8) -> jax.Array:
    assert img.ndim == 3, "Input must be (C, H, W)"
    C, H, W = img.shape
    g = _gaussian_1d(kernel_size)

    # Left (vertical, along H) and right (horizontal, along W) conv matrices.
    # blur(z) = A @ z @ B  ==  2-D Gaussian conv of z with zero padding P.
    A = jnp.asarray(_band_matrix(H, g))       # (H, H): A[i, u] = g[u - i + P]
    B = jnp.asarray(_band_matrix(W, g).T)     # (W, W): B[v, j] = g[v - j + P]

    def kernel(x_ref, a_ref, b_ref, out_ref):
        x = x_ref[0].astype(jnp.float32)      # (H, W) one channel, cast in-kernel
        Am = a_ref[...]                       # (H, H) vertical taps
        Bm = b_ref[...]                       # (W, W) horizontal taps

        def gauss_blur(z):
            # Zero-padded separable Gaussian conv as two MXU matmuls.
            zh = jnp.dot(z, Bm, precision=lax.Precision.HIGHEST,
                         preferred_element_type=jnp.float32)
            return jnp.dot(Am, zh, precision=lax.Precision.HIGHEST,
                           preferred_element_type=jnp.float32)

        mean = gauss_blur(x)
        centered = x - mean
        var = gauss_blur(centered * centered)
        out_ref[0] = (centered * lax.rsqrt(var + epsilon)).astype(out_ref.dtype)

    out = pl.pallas_call(
        kernel,
        out_shape=jax.ShapeDtypeStruct((C, H, W), img.dtype),
        grid=(C,),
        in_specs=[
            pl.BlockSpec((1, H, W), lambda c: (c, 0, 0)),   # one channel per step
            pl.BlockSpec((H, H), lambda c: (0, 0)),          # A (resident)
            pl.BlockSpec((W, W), lambda c: (0, 0)),          # B (resident)
        ],
        out_specs=pl.BlockSpec((1, H, W), lambda c: (c, 0, 0)),
        compiler_params=pltpu.CompilerParams(
            dimension_semantics=("parallel",)),
    )(img, A, B)
    return out


def _reference(img, kernel_size=9, epsilon=1e-8):
    # Pure-JAX reference mirroring the PyTorch forward: explicit zero-padded
    # tap-sum convolution in f32 (no MXU / precision ambiguity).
    g = _gaussian_1d(kernel_size)
    K = kernel_size
    P = K // 2
    x = img.astype(jnp.float32)
    Hh, Ww = x.shape[1], x.shape[2]

    def conv2d_zero_pad(z):
        zp = jnp.pad(z, ((0, 0), (P, P), (P, P)))
        out = jnp.zeros_like(z)
        for a in range(K):
            for b in range(K):
                out = out + (float(g[a]) * float(g[b])) * zp[:, a:a + Hh, b:b + Ww]
        return out

    mean = conv2d_zero_pad(x)
    centered = x - mean
    std = jnp.sqrt(conv2d_zero_pad(centered * centered) + epsilon)
    return (centered / std).astype(img.dtype)


if __name__ == "__main__":
    key = jax.random.PRNGKey(0)
    C, H, W = 4, 16, 16
    img = jax.random.normal(key, (C, H, W), dtype=jnp.float32)

    out = jax.block_until_ready(
        local_contrast_normalization(img, kernel_size=9, epsilon=1e-8))
    ref = jax.block_until_ready(_reference(img, kernel_size=9, epsilon=1e-8))

    assert out.shape == (C, H, W) and out.dtype == img.dtype
    max_err = float(jnp.max(jnp.abs(out - ref)))
    # HIGHEST-precision MXU passes keep the error ~1e-6; allow margin for the
    # matmul-vs-tap-sum summation order.
    assert jnp.allclose(out, ref, rtol=1e-3, atol=1e-3), \
        f"mismatch vs reference, max abs err {max_err}"

    print("KERNEL_OK")
</pallas_src>

<mosaic_0001>
module attributes {stable_mosaic.version = 11 : i64} {
  func.func @kernel(%arg0: i32, %arg1: memref<1x16x16xf32, #tpu.memory_space<vmem>>, %arg2: memref<16x16xf32, #tpu.memory_space<vmem>>, %arg3: memref<16x16xf32, #tpu.memory_space<vmem>>, %arg4: memref<1x16x16xf32, #tpu.memory_space<vmem>>) attributes {dimension_semantics = [#tpu.dimension_semantics<parallel>], iteration_bounds = array<i64: 4>, scalar_prefetch = 0 : i64, scratch_operands = 0 : i64, tpu.core_type = #tpu.core_type<tc>, window_params = [{transform_indices = @transform_0, window_bounds = array<i64: 1, 16, 16>}, {pipeline_mode = #tpu.pipeline_mode<synchronous>, transform_indices = @transform_1, window_bounds = array<i64: 16, 16>}, {pipeline_mode = #tpu.pipeline_mode<synchronous>, transform_indices = @transform_2, window_bounds = array<i64: 16, 16>}, {transform_indices = @transform_3, window_bounds = array<i64: 1, 16, 16>}]} {
    %c0 = arith.constant 0 : index
    %c0_0 = arith.constant 0 : index
    %c0_1 = arith.constant 0 : index
    %0 = vector.load %arg1[%c0, %c0_0, %c0_1] : memref<1x16x16xf32, #tpu.memory_space<vmem>>, vector<1x16x16xf32>
    %1 = vector.shape_cast %0 : vector<1x16x16xf32> to vector<16x16xf32>
    %c0_2 = arith.constant 0 : index
    %c0_3 = arith.constant 0 : index
    %2 = vector.load %arg2[%c0_2, %c0_3] : memref<16x16xf32, #tpu.memory_space<vmem>>, vector<16x16xf32>
    %c0_4 = arith.constant 0 : index
    %c0_5 = arith.constant 0 : index
    %3 = vector.load %arg3[%c0_4, %c0_5] : memref<16x16xf32, #tpu.memory_space<vmem>>, vector<16x16xf32>
    %cst = arith.constant dense<0.000000e+00> : vector<16x16xf32>
    %4 = tpu.matmul %1, %3, %cst {dimension_numbers = #tpu.dot_dimension_numbers<[1], [0], [0], [1], [0, 0, 1, 1], [], []>, precision = #tpu.contract_precision<fp32>} : vector<16x16xf32>, vector<16x16xf32>, vector<16x16xf32> -> vector<16x16xf32>
    %cst_6 = arith.constant dense<0.000000e+00> : vector<16x16xf32>
    %5 = tpu.matmul %2, %4, %cst_6 {dimension_numbers = #tpu.dot_dimension_numbers<[1], [0], [0], [1], [0, 0, 1, 1], [], []>, precision = #tpu.contract_precision<fp32>} : vector<16x16xf32>, vector<16x16xf32>, vector<16x16xf32> -> vector<16x16xf32>
    %6 = arith.subf %1, %5 : vector<16x16xf32>
    %7 = arith.mulf %6, %6 : vector<16x16xf32>
    %cst_7 = arith.constant dense<0.000000e+00> : vector<16x16xf32>
    %8 = tpu.matmul %7, %3, %cst_7 {dimension_numbers = #tpu.dot_dimension_numbers<[1], [0], [0], [1], [0, 0, 1, 1], [], []>, precision = #tpu.contract_precision<fp32>} : vector<16x16xf32>, vector<16x16xf32>, vector<16x16xf32> -> vector<16x16xf32>
    %cst_8 = arith.constant dense<0.000000e+00> : vector<16x16xf32>
    %9 = tpu.matmul %2, %8, %cst_8 {dimension_numbers = #tpu.dot_dimension_numbers<[1], [0], [0], [1], [0, 0, 1, 1], [], []>, precision = #tpu.contract_precision<fp32>} : vector<16x16xf32>, vector<16x16xf32>, vector<16x16xf32> -> vector<16x16xf32>
    %cst_9 = arith.constant 9.99999993E-9 : f32
    %10 = vector.broadcast %cst_9 : f32 to vector<16x16xf32>
    %11 = arith.addf %9, %10 : vector<16x16xf32>
    %12 = math.rsqrt %11 : vector<16x16xf32>
    %13 = arith.mulf %6, %12 : vector<16x16xf32>
    %c0_10 = arith.constant 0 : index
    %c0_11 = arith.constant 0 : index
    %c0_12 = arith.constant 0 : index
    %14 = vector.load %arg4[%c0_10, %c0_11, %c0_12] : memref<1x16x16xf32, #tpu.memory_space<vmem>>, vector<1x16x16xf32>
    %15 = vector.shape_cast %14 : vector<1x16x16xf32> to vector<16x16xf32>
    %16 = vector.shape_cast %13 : vector<16x16xf32> to vector<1x16x16xf32>
    tpu.vector_store %arg4[%c0_10, %c0_11, %c0_12], %16 {strides = array<i32>} : memref<1x16x16xf32, #tpu.memory_space<vmem>>, vector<1x16x16xf32>,
    return
  }
  func.func @transform_0(%arg0: i32) -> (i32, i32, i32) {
    %c0_i32 = arith.constant 0 : i32
    %c0_i32_0 = arith.constant 0 : i32
    %c0_i32_1 = arith.constant 0 : i32
    return %arg0, %c0_i32, %c0_i32_0 : i32, i32, i32
  }
  func.func @transform_1(%arg0: i32) -> (i32, i32) {
    %c0_i32 = arith.constant 0 : i32
    %c0_i32_0 = arith.constant 0 : i32
    %c0_i32_1 = arith.constant 0 : i32
    return %c0_i32, %c0_i32_0 : i32, i32
  }
  func.func @transform_2(%arg0: i32) -> (i32, i32) {
    %c0_i32 = arith.constant 0 : i32
    %c0_i32_0 = arith.constant 0 : i32
    %c0_i32_1 = arith.constant 0 : i32
    return %c0_i32, %c0_i32_0 : i32, i32
  }
  func.func @transform_3(%arg0: i32) -> (i32, i32, i32) {
    %c0_i32 = arith.constant 0 : i32
    %c0_i32_0 = arith.constant 0 : i32
    %c0_i32_1 = arith.constant 0 : i32
    return %arg0, %c0_i32, %c0_i32_0 : i32, i32, i32
  }
}

</mosaic_0001>

<bundles_post_ra>
// kernel: tpu_custom_call.1
= control target key start
LH: loop header
LB: loop body
LE: loop exit
PB: predicated region body
PF: predicated region fallthrough
CT: control target
= control target key end

     0   :  { %8 = vsyncpa [#allocation3], 0  ;;  %s3390_s0 = inlined_call_operand.hbm [shape: f32[4,16,16], index: 0, kind: input, shape index: {}]   ;;  %s3391_s1 = inlined_call_operand.hbm [shape: f32[16,16], index: 1, kind: input, shape index: {}]   ;;  %s3392_s2 = inlined_call_operand.hbm [shape: f32[16,16], index: 2, kind: input, shape index: {}]   ;;  %s3393_s3 = inlined_call_operand.hbm [shape: f32[4,16,16], index: 3, kind: output, shape index: {}]  }
   0x1   :  { %10 = vsyncpa [#allocation3 + $0x1], 0 }
   0x2   :  { %11 = vsyncpa [#allocation6], 0 }
   0x3   :  { %12 = vsyncpa [#allocation4], 0 }
   0x4   :  { %14 = vsyncpa [#allocation4 + $0x1], 0  ;;  %s3050_s12 = smov 0   ;;  %s3052_s13 = smov 0  }
   0x5   :  { %s3054_s14 = smov 0   ;;  %s3056_s15 = smov 0  }
   0x6 LB: > { %s3071_s16 = sadd.s32 4294967295, %s3020_s15   ;;  %s2367_s17 = sadd.s32 4294967294, %s3020_s15   ;;  %s3020_s15 = sphi %s3056_s15, %s3412_s15   ;;  %s3016_s14 = sphi %s3054_s14, %s3411_s14   ;;  %s3012_s13 = sphi %s3052_s13, %s3410_s13   ;;  %s3008_s12 = sphi %s3050_s12, %s3409_s12  }
   0x7   : > { %p40_p0 = scmp.ne.s32.totalorder %s3012_s13, %s3008_s12  ;;  %p3394_p1 = scmp.eq.s32.totalorder %s3071_s16, 0 }
   0x8   : > { %p112_p3 = scmp.eq.s32.totalorder %s2367_s17, 3  ;;  %p2368_p5 = scmp.ge.s32.totalorder %s3020_s15, 1 }
   0x9   : > { %p3080_p4 = por %p3394_p1, %p40_p0  ;;  %p119_p7 = scmp.lt.s32.totalorder %s3020_s15, 5 }
   0xa   : > { %p3085_p6 = por %p112_p3, %p40_p0  ;;  %s3022_s21 = smov [#allocation5]  }
   0xb   : > { %s3397_s18 = scalar_select %p3080_p4, 1, 0 }
   0xc   : > { %s3398_s19 = scalar_select %p3085_p6, 1, 0 }
   0xd   : > { %p3090_p8 = pnand %p2368_p5, %p119_p7  ;;  %s131_s22 = sshll.u32 %s3022_s21, 4  ;;  %s132_s22 = int_to_ptr.vmem [resolvable:$true] %s131_s22 }
   0xe   : > { %s3023_s24 = smov [#allocation7]   ;;  %s2864_s28 = scalar_lea.hbm %s3391_s1, 256 }
   0xf   : > { %s3399_s20 = scalar_select %p3090_p8, 1, 0 }
  0x10   : > { %p2801_p9 = pneg %p3090_p8  ;;  %s144_s25 = sshll.u32 %s3023_s24, 4  ;;  %s3102_s25 = int_to_ptr.vmem [resolvable:$true] %s144_s25 }
  0x11   : > { %p2865_p11 = scmp.ne.s32.totalorder %s3391_s1, %s2864_s28  ;;  %p2871_p3 = scmp.lt.u32.totalorder %s2864_s28, %s3391_s1 }
  0x12   : > { %p3098_p10 = pnand %p2801_p9, %p3394_p1 }
  0x14   : > { %p2866_p12 = pneg %p3098_p10 }
  0x16   : > { %p2867_p13 = pnand %p2866_p12, %p2865_p11 }
  0x18   : > { %p2868_p0 = pneg %p2867_p13 }
  0x1a   : > { %p2873_p5 = pnand %p2871_p3, %p2868_p0 }
  0x1c   : > { %2876 = shalt.err (!%p2873_p5)
}
  0x1d   : > { %s2877_s6 = scalar_lea.vmem %s132_s22, 256  ;;  %p2885_p2 = scmp.lt.s32.totalorder %s132_s22, %s132_s22 }
  0x1e   : > { %p2878_p7 = scmp.ne.s32.totalorder %s132_s22, %s2877_s6  ;;  %p2886_p6 = scmp.lt.s32.totalorder %s2877_s6, %s2877_s6 }
  0x20   : > { %p2880_p9 = pnand %p2878_p7, %p2866_p12  ;;  %p2887_p4 = por %p2886_p6, %p2885_p2 }
  0x22   : > { %p2881_p1 = pneg %p2880_p9 }
  0x24   : > { %p2888_p8 = pnand %p2887_p4, %p2881_p1 }
  0x26   : > { %2891 = shalt.err (!%p2888_p8)
}
  0x27   : > { %s3024_s7 = smov 128   ;;  %s3025_s8 = smov 8  }
  0x28   : > { %2804 = dma.hbm_to_vmem [thread:$0]  (!%p3098_p10), %s3391_s1, 256, %s132_s22, [#allocation6], %s3024_s7, %s3024_s7, %s3025_s8  }
  0x29   : > { %s2892_s21 = scalar_lea.hbm %s3392_s2, 256 }
  0x2a   : > { %p2893_p1 = scmp.ne.s32.totalorder %s3392_s2, %s2892_s21  ;;  %p2899_p6 = scmp.lt.u32.totalorder %s2892_s21, %s3392_s2 }
  0x2c   : > { %p2895_p2 = pnand %p2893_p1, %p2866_p12 }
  0x2e   : > { %p2896_p4 = pneg %p2895_p2 }
  0x30   : > { %p2901_p8 = pnand %p2899_p6, %p2896_p4 }
  0x32   : > { %2904 = shalt.err (!%p2901_p8)
}
  0x33   : > { %s2905_s22 = scalar_lea.vmem %s3102_s25, 256  ;;  %p2913_p3 = scmp.lt.s32.totalorder %s3102_s25, %s3102_s25 }
  0x34   : > { %p2906_p11 = scmp.ne.s32.totalorder %s3102_s25, %s2905_s22  ;;  %p2914_p5 = scmp.lt.s32.totalorder %s2905_s22, %s2905_s22 }
  0x36   : > { %p2908_p13 = pnand %p2906_p11, %p2866_p12  ;;  %p2915_p7 = por %p2914_p5, %p2913_p3 }
  0x38   : > { %p2909_p0 = pneg %p2908_p13 }
  0x3a   : > { %p2916_p9 = pnand %p2915_p7, %p2909_p0 }
  0x3c   : > { %2919 = shalt.err (!%p2916_p9)
}
  0x3d   : > { %2807 = dma.hbm_to_vmem [thread:$0]  (!%p3098_p10), %s3392_s2, 256, %s3102_s25, [#allocation6], %s3024_s7, %s3024_s7, %s3025_s8  }
  0x3e   : > { %s3158_s23 = sadd.s32 1, %s3020_s15   ;;  %s27_s4 = sadd.s32 1, %s3016_s14 }
  0x3f   : > { %s24_s5 = ssub.s32 %s3020_s15, %s3158_s23  ;;  %p34_p12 = scmp.ne.s32.totalorder %s3016_s14, %s3012_s13 }
  0x40   : > { %p25_p1 = scmp.eq.s32.totalorder %s24_s5, 0  ;;  %p35_p2 = scmp.eq.s32.totalorder %s3020_s15, 0 }
  0x41   : > { %p3401_p4 = scmp.eq.s32.totalorder %s3071_s16, 3  ;;  %p2818_p8 = scmp.lt.s32.totalorder %s3020_s15, 4 }
  0x42   : > { %s3174_s9 = scalar_select %p25_p1, %s3016_s14, %s27_s4  }
  0x43   : > { %p3168_p6 = por %p3401_p4, %p34_p12  ;;  %p36_p11 = por %p35_p2, %p34_p12 }
  0x44   : > { %s158_s10 = sand.u32 1, %s3016_s14   ;;  %s2385_s25 = sshll.u32 %s3020_s15, 8 }
  0x45   : > { %s2372_s11 = sshll.u32 %s158_s10, 4  ;;  %s3181_s24 = scalar_lea.hbm %s3390_s0, %s2385_s25 }
  0x46   : > { %s162_s26 = scalar_lea.vmem [#allocation2], %s2372_s11  ;;  %p3185_p10 = pnand %p2818_p8, %p36_p11 }
  0x47   : > { %s169_s27 = sshll.u32 %s162_s26, 4  ;;  %s3189_s22 = scalar_lea.sflag [#allocation3], %s158_s10  ;;  %s3183_s27 = int_to_ptr.vmem [resolvable:$true] %s169_s27 }
  0x48   : > { %s2920_s29 = scalar_lea.hbm %s3181_s24, 256  ;;  %p2922_p0 = pneg %p3185_p10 }
  0x49   : > { %p2921_p13 = scmp.ne.s32.totalorder %s3181_s24, %s2920_s29  ;;  %s2925_s5 = scalar_lea.hbm %s3390_s0, 1024 }
  0x4a   : > { %p2926_p7 = scmp.lt.u32.totalorder %s3181_s24, %s3390_s0  ;;  %p2927_p9 = scmp.lt.u32.totalorder %s2925_s5, %s2920_s29 }
  0x4b   : > { %p2923_p3 = pnand %p2922_p0, %p2921_p13  ;;  %p2929_p1 = scmp.lt.u32.totalorder %s2920_s29, %s3181_s24 }
  0x4c   : > { %p2928_p12 = por %p2927_p9, %p2926_p7 }
  0x4d   : > { %p2924_p5 = pneg %p2923_p3 }
  0x4e   : > { %p2930_p2 = por %p2929_p1, %p2928_p12 }
  0x50   : > { %p2931_p4 = pnand %p2930_p2, %p2924_p5 }
  0x52   : > { %2934 = shalt.err (!%p2931_p4)
}
  0x53   : > { %s2935_s10 = scalar_lea.vmem %s3183_s27, 256  ;;  %s3026_s17 = smov [#allocation2]  }
  0x54   : > { %p2936_p8 = scmp.ne.s32.totalorder %s3183_s27, %s2935_s10  ;;  %s2940_s21 = sshll.u32 %s3026_s17, 4  ;;  %s2941_s21 = int_to_ptr.vmem [resolvable:$false] %s2940_s21 }
  0x55   : > { %s2942_s26 = scalar_lea.vmem %s2941_s21, 512  ;;  %p2943_p3 = scmp.lt.s32.totalorder %s3183_s27, %s2941_s21 }
  0x56   : > { %p2938_p11 = pnand %p2936_p8, %p2922_p0  ;;  %p2944_p7 = scmp.lt.s32.totalorder %s2942_s26, %s2935_s10 }
  0x58   : > { %p2939_p13 = pneg %p2938_p11  ;;  %p2945_p9 = por %p2944_p7, %p2943_p3 }
  0x5a   : > { %p2946_p12 = pnand %p2945_p9, %p2939_p13 }
  0x5c   : > { %2949 = shalt.err (!%p2946_p12)
}
  0x5d   : > { %2811 = dma.hbm_to_vmem [thread:$0]  (!%p3185_p10), %s3181_s24, 256, %s3183_s27, %s3189_s22, %s3024_s7, %s3024_s7, %s3025_s8  }
  0x5e   : > { %p3404_p0 = scmp.ne.s32.totalorder %s3399_s20, 0 }
  0x5f   : > { %s3223_s29 = sand.u32 (!%p3404_p0), 1, %s3012_s13   ;;  %p3405_p5 = scmp.ne.s32.totalorder (!%p3404_p0), %s3397_s18, 0 }
  0x60   : > { %181 = sbr.rel (%p3404_p0) target bundleno = 1195 (0x4ab), region = 32  ;;  %s2376_s30 = sshll.u32 (!%p3404_p0), %s3223_s29, 4 }
  0x61   : > { %s184_s4 = scalar_lea.sflag (!%p3404_p0), [#allocation3], %s3223_s29  ;;  %s187_s28 = scalar_lea.vmem (!%p3404_p0), [#allocation2], %s2376_s30 }
  0x67   : > { %2995 = dma.done.wait (%p3405_p5), %s184_s4, 256  }
  0x68   : > { %2997 = vsyncadd (%p3405_p5), %s184_s4, 4294967040  ;;  %p3406_p10 = scmp.eq.s32.totalorder %s3071_s16, 0 }
  0x6a   : > { %2999 = dma.done.wait (%p3406_p10), [#allocation6], 512   ;;  %p3407_p1 = pmov %p3406_p10 }
  0x6b   : > { %vm224_vm0 = vcmask 130048   ;;  %v222_v0 = vld [vmem:[#allocation7] sm:$0xff]  ;;  %v223_v1 = vld [vmem:[#allocation7 + $0x8] sm:$0xff]  ;;  %v220_v30 = vld [vmem:[#allocation5] sm:$0xff]  ;;  %s2386_s18 = sshll.u32 %s3071_s16, 8  ;;  %s217_s20 = scalar_lea.vmem [#allocation8], %s2376_s30 }
  0x6c   : > { %3001 = vsyncadd (%p3407_p1), [#allocation6], 4294966784  ;;  %v3237_v2 = vld [vmem:[%s187_s28] sm:$0xff]  ;;  %v232_v3 = vand.u32 4294901760, %v222_v0  ;;  %v235_v4 = vand.u32 4294901760, %v223_v1  ;;  %v3241_v6 = vld [vmem:[%s187_s28 + $0x8] sm:$0xff]  ;;  %s3342_s27 = scalar_lea.hbm %s3393_s3, %s2386_s18 }
  0x6d   : > { %v226_v5 = vsel %vm224_vm0, %v3237_v2, 0  ;;  %v229_v8 = vsel %vm224_vm0, %v3241_v6, 0  ;;  %v734_v31 = vsel %vm224_vm0, %v220_v30, 0  ;;  %v221_v37 = vld [vmem:[#allocation5 + $0x8] sm:$0xff]  ;;  %s2275_s7 = sshll.u32 %s217_s20, 4  ;;  %s2262_s16 = scalar_lea.sflag [#allocation4], %s3223_s29  ;;  %s3344_s7 = int_to_ptr.vmem [resolvable:$true] %s2275_s7 }
  0x6e   : > { %v298_v7 = vand.u32 4294901760, %v226_v5  ;;  %v3245_v9 = vpack.c.bf16 %v235_v4, %v232_v3  ;;  %v308_v10 = vand.u32 4294901760, %v229_v8  ;;  %v320_v11 = vsub.f32 %v222_v0, %v232_v3  ;;  %s2950_s22 = scalar_lea.vmem %s3344_s7, 256  ;;  %s3027_s5 = smov [#allocation8]  }
  0x6f   : > { %v327_v12 = vsub.f32 %v223_v1, %v235_v4  ;;  %v3269_v32 = vand.u32 4294901760, %v734_v31  ;;  %v737_v38 = vsel %vm224_vm0, %v221_v37, 0  ;;  %p2951_p2 = scmp.ne.s32.totalorder %s3344_s7, %s2950_s22  ;;  %s2954_s11 = sshll.u32 %s3027_s5, 4  ;;  %s2955_s11 = int_to_ptr.vmem [resolvable:$false] %s2954_s11 }
  0x70   : > { %v299_v13 = vsub.f32 %v226_v5, %v298_v7  ;;  %2652 = vmatprep.subr.bf16.mxu0 %v3245_v9  ;;  %v309_v14 = vsub.f32 %v229_v8, %v308_v10  ;;  %v321_v15 = vand.u32 4294901760, %v320_v11  ;;  %v3280_v39 = vand.u32 4294901760, %v737_v38  ;;  %s2956_s25 = scalar_lea.vmem %s2955_s11, 512  ;;  %p2957_p11 = scmp.lt.s32.totalorder %s3344_s7, %s2955_s11 }
  0x71   : > { %v328_v16 = vand.u32 4294901760, %v327_v12  ;;  %2654 = vmatpush3.bf16.msra.mxu0 %v3245_v9  ;;  %v3251_v28 = vpack.c.bf16 %v327_v12, %v320_v11  ;;  %v3272_v33 = vsub.f32 %v734_v31, %v3269_v32  ;;  %p2952_p4 = pnand %p2951_p2, %p3168_p6  ;;  %p2958_p13 = scmp.lt.s32.totalorder %s2956_s25, %s2950_s22 }
  0x72   : > { %v300_v17 = vand.u32 4294901760, %v299_v13  ;;  %v310_v18 = vand.u32 4294901760, %v309_v14  ;;  %v322_v19 = vsub.f32 %v320_v11, %v321_v15  ;;  %v3283_v40 = vsub.f32 %v737_v38, %v3280_v39 }
  0x73   : > { %v329_v20 = vsub.f32 %v327_v12, %v328_v16  ;;  %v3258_v29 = vpack.c.bf16 %v328_v16, %v321_v15  ;;  %v3275_v34 = vand.u32 4294901760, %v3272_v33  ;;  %p2953_p8 = pneg %p2952_p4  ;;  %p2959_p3 = por %p2958_p13, %p2957_p11 }
  0x74   : > { %v301_v21 = vsub.f32 %v299_v13, %v300_v17  ;;  %v311_v22 = vsub.f32 %v309_v14, %v310_v18  ;;  %v323_v23 = vand.u32 4294901760, %v322_v19  ;;  %v3286_v41 = vand.u32 4294901760, %v3283_v40 }
  0x75   : > { %v330_v24 = vand.u32 4294901760, %v329_v20  ;;  %v809_v35 = vsub.f32 %v3272_v33, %v3275_v34  ;;  %p2960_p7 = pnand %p2959_p3, %p2953_p8 }
  0x76   : > { %v302_v25 = vand.u32 4294901760, %v301_v21  ;;  %v312_v26 = vand.u32 4294901760, %v311_v22  ;;  %v819_v46 = vsub.f32 %v3283_v40, %v3286_v41 }
  0x77   : > { %v3249_v27 = vpack.c.bf16 %v330_v24, %v323_v23  ;;  %v810_v36 = vand.u32 4294901760, %v809_v35 }
  0x78   : > { %2487 = vmatprep.mubr.f32.mxu0 %v302_v25  ;;  %v3290_v52 = vand.u32 4294901760, %v819_v46 }
  0x79   : > { %2488 = vmatmul.mubr.f32.vlgmr.msra.gmra.mrb[0].mxu0 %v312_v26  ;;  %2656 = vmatprep.subr.bf16.mxu0 %v3249_v27 }
  0x7a   : > { %2658 = vmatpush3.bf16.msra.mxu0 %v3249_v27  ;;  %2494 = vmatprep.mubr.f32.mxu0 %v298_v7 }
  0x7b   : > { %2660 = vmatprep.subr.bf16.mxu0 %v3251_v28  ;;  %2529 = vmatprep.mubr.f32.mxu1 %v810_v36 }
  0x81   : > { %2495 = vmatmul.mubr.f32.vlgmr.msra.gmra.mrb[0].mxu0 %v308_v10 }
  0x82   : > { %2662 = vmatpush3.bf16.msra.mxu0 %v3251_v28  ;;  %2501 = vmatprep.mubr.f32.mxu0 %v299_v13 }
  0x83   : > { %2664 = vmatprep.subr.bf16.mxu0 %v3245_v9 }
  0x89   : > { %2502 = vmatmul.mubr.f32.vlgmr.msra.gmra.mrb[0].mxu0 %v309_v14 }
  0x8a   : > { %2666 = vmatpush3.bf16.msra.mxu0 %v3245_v9  ;;  %2508 = vmatprep.mubr.f32.mxu0 %v300_v17 }
  0x8b   : > { %2668 = vmatprep.subr.bf16.mxu0 %v3258_v29 }
  0x91   : > { %2509 = vmatmul.mubr.f32.vlgmr.msra.gmra.mrb[0].mxu0 %v310_v18 }
  0x92   : > { %2670 = vmatpush3.bf16.msra.mxu0 %v3258_v29  ;;  %2515 = vmatprep.mubr.f32.mxu0 %v298_v7 }
  0x93   : > { %2672 = vmatprep.subr.bf16.mxu0 %v3245_v9 }
  0x99   : > { %2516 = vmatmul.mubr.f32.vlgmr.msra.gmra.mrb[0].mxu0 %v308_v10 }
  0x9a   : > { %2674 = vmatpush3.bf16.msra.mxu0 %v3245_v9  ;;  %2522 = vmatprep.mubr.f32.mxu0 %v298_v7 }
  0x9b   : > { %2700 = vmatprep.subr.bf16.mxu0 %v3245_v9 }
  0xa1   : > { %2523 = vmatmul.mubr.f32.vlgmr.msra.gmra.mrb[0].mxu0 %v308_v10 }
  0xa2   : > { %2702 = vmatpush3.bf16.msra.mxu0 %v3245_v9 }
  0xa3   : > { %2704 = vmatprep.subr.bf16.mxu0 %v3249_v27 }
 0x174   : > { %v2524_v42 = vpop.f32.mrb[0].mxu0 }
 0x175   : > { %v743_v43 = vand.u32 4294901760, %v2524_v42  ;;  %v723_v44 = vpop.f32.mrb[1].mxu0 }
 0x176   : > { %v740_v45 = vand.u32 4294901760, %v723_v44 }
 0x177   : > { %v835_v47 = vsub.f32 %v2524_v42, %v743_v43 }
 0x178   : > { %v2675_v48 = vpack.c.bf16 %v743_v43, %v740_v45  ;;  %v828_v49 = vsub.f32 %v723_v44, %v740_v45 }
 0x179   : > { %v836_v50 = vand.u32 4294901760, %v835_v47 }
 0x17a   : > { %v829_v51 = vand.u32 4294901760, %v828_v49  ;;  %2676 = vmatprep.subr.bf16.mxu1 %v2675_v48  ;;  %v2683_v53 = vpack.c.bf16 %v835_v47, %v828_v49 }
 0x17b   : > { %v837_v54 = vsub.f32 %v835_v47, %v836_v50  ;;  %2678 = vmatpush3.bf16.msra.mxu1 %v2675_v48 }
 0x17c   : > { %v830_v55 = vsub.f32 %v828_v49, %v829_v51  ;;  %v2691_v56 = vpack.c.bf16 %v836_v50, %v829_v51 }
 0x17d   : > { %v838_v57 = vand.u32 4294901760, %v837_v54 }
 0x17e   : > { %2530 = vmatmul.mubr.f32.vlgmr.msra.gmra.mrb[0].mxu1 %v3290_v52  ;;  %v831_v58 = vand.u32 4294901760, %v830_v55 }
 0x17f   : > { %2536 = vmatprep.mubr.f32.mxu1 %v3269_v32 }
 0x180   : > { %v2679_v59 = vpack.c.bf16 %v838_v57, %v831_v58 }
 0x182   : > { %2680 = vmatprep.subr.bf16.mxu1 %v2679_v59 }
 0x183   : > { %2682 = vmatpush3.bf16.msra.mxu1 %v2679_v59 }
 0x184   : > { %2684 = vmatprep.subr.bf16.mxu1 %v2683_v53 }
 0x186   : > { %2537 = vmatmul.mubr.f32.vlgmr.msra.gmra.mrb[0].mxu1 %v3280_v39 }
 0x187   : > { %2686 = vmatpush3.bf16.msra.mxu1 %v2683_v53  ;;  %2543 = vmatprep.mubr.f32.mxu1 %v3272_v33 }
 0x188   : > { %2688 = vmatprep.subr.bf16.mxu1 %v2675_v48 }
 0x18e   : > { %2544 = vmatmul.mubr.f32.vlgmr.msra.gmra.mrb[0].mxu1 %v3283_v40 }
 0x18f   : > { %2690 = vmatpush3.bf16.msra.mxu1 %v2675_v48  ;;  %2550 = vmatprep.mubr.f32.mxu1 %v3275_v34 }
 0x190   : > { %2692 = vmatprep.subr.bf16.mxu1 %v2691_v56 }
 0x196   : > { %2551 = vmatmul.mubr.f32.vlgmr.msra.gmra.mrb[0].mxu1 %v3286_v41 }
 0x197   : > { %2694 = vmatpush3.bf16.msra.mxu1 %v2691_v56  ;;  %2557 = vmatprep.mubr.f32.mxu1 %v3269_v32 }
 0x198   : > { %2696 = vmatprep.subr.bf16.mxu1 %v2675_v48 }
 0x19e   : > { %2558 = vmatmul.mubr.f32.vlgmr.msra.gmra.mrb[0].mxu1 %v3280_v39 }
 0x19f   : > { %2698 = vmatpush3.bf16.msra.mxu1 %v2675_v48  ;;  %2564 = vmatprep.mubr.f32.mxu1 %v3269_v32 }
 0x1a6   : > { %2565 = vmatmul.mubr.f32.vlgmr.msra.gmra.mrb[0].mxu1 %v3280_v39 }
 0x1a7   : > { %2613 = vmatprep.mubr.f32.mxu1 %v810_v36 }
 0x279   : > { %v2566_v60 = vpop.f32.mrb[0].mxu1 }
 0x27a   : > { %v3304_v61 = vsub.f32 %v3241_v6, %v2566_v60  ;;  %v1231_v62 = vpop.f32.mrb[1].mxu1 }
 0x27b   : > { %v3307_v63 = vsub.f32 %v3237_v2, %v1231_v62 }
 0x27c   : > { %v1244_v0 = vmul.f32 %v3304_v61, %v3304_v61 }
 0x27d   : > { %v1243_v1 = vmul.f32 %v3307_v63, %v3307_v63 }
 0x27e   : > { %v1249_v3 = vsel %vm224_vm0, %v1244_v0, 0 }
 0x27f   : > { %v1328_v4 = vand.u32 4294901760, %v1249_v3  ;;  %v1246_v5 = vsel %vm224_vm0, %v1243_v1, 0 }
 0x280   : > { %v1318_v7 = vand.u32 4294901760, %v1246_v5 }
 0x281   : > { %v1329_v8 = vsub.f32 %v1249_v3, %v1328_v4 }
 0x282   : > { %v1319_v10 = vsub.f32 %v1246_v5, %v1318_v7 }
 0x283   : > { %v1330_v6 = vand.u32 4294901760, %v1329_v8 }
 0x284   : > { %v1320_v11 = vand.u32 4294901760, %v1319_v10 }
 0x285   : > { %v1331_v12 = vsub.f32 %v1329_v8, %v1330_v6 }
 0x286   : > { %v1321_v13 = vsub.f32 %v1319_v10, %v1320_v11 }
 0x287   : > { %v1332_v14 = vand.u32 4294901760, %v1331_v12 }
 0x288   : > { %v1322_v2 = vand.u32 4294901760, %v1321_v13 }
 0x28a   : > { %2571 = vmatprep.mubr.f32.mxu0 %v1322_v2 }
 0x28b   : > { %2572 = vmatmul.mubr.f32.vlgmr.msra.gmra.mrb[2].mxu0 %v1332_v14 }
 0x28c   : > { %2578 = vmatprep.mubr.f32.mxu0 %v1318_v7  ;;  %2706 = vmatpush3.bf16.msra.mxu0 %v3249_v27 }
 0x28d   : > { %2708 = vmatprep.subr.bf16.mxu0 %v3251_v28 }
 0x293   : > { %2579 = vmatmul.mubr.f32.vlgmr.msra.gmra.mrb[2].mxu0 %v1328_v4 }
 0x294   : > { %2585 = vmatprep.mubr.f32.mxu0 %v1319_v10  ;;  %2710 = vmatpush3.bf16.msra.mxu0 %v3251_v28 }
 0x295   : > { %2712 = vmatprep.subr.bf16.mxu0 %v3245_v9 }
 0x29b   : > { %2586 = vmatmul.mubr.f32.vlgmr.msra.gmra.mrb[2].mxu0 %v1329_v8 }
 0x29c   : > { %2592 = vmatprep.mubr.f32.mxu0 %v1320_v11  ;;  %2714 = vmatpush3.bf16.msra.mxu0 %v3245_v9 }
 0x29d   : > { %2716 = vmatprep.subr.bf16.mxu0 %v3258_v29 }
 0x2a3   : > { %2593 = vmatmul.mubr.f32.vlgmr.msra.gmra.mrb[2].mxu0 %v1330_v6 }
 0x2a4   : > { %2599 = vmatprep.mubr.f32.mxu0 %v1318_v7  ;;  %2718 = vmatpush3.bf16.msra.mxu0 %v3258_v29 }
 0x2a5   : > { %2720 = vmatprep.subr.bf16.mxu0 %v3245_v9 }
 0x2ab   : > { %2600 = vmatmul.mubr.f32.vlgmr.msra.gmra.mrb[2].mxu0 %v1328_v4 }
 0x2ac   : > { %2606 = vmatprep.mubr.f32.mxu0 %v1318_v7  ;;  %2722 = vmatpush3.bf16.msra.mxu0 %v3245_v9 }
 0x2b3   : > { %2607 = vmatmul.mubr.f32.vlgmr.msra.gmra.mrb[2].mxu0 %v1328_v4 }
 0x386   : > { %v2608_v15 = vpop.f32.mrb[2].mxu0 }
 0x387   : > { %v1757_v16 = vand.u32 4294901760, %v2608_v15  ;;  %v1743_v17 = vpop.f32.mrb[3].mxu0 }
 0x388   : > { %v1754_v18 = vand.u32 4294901760, %v1743_v17 }
 0x389   : > { %v1849_v19 = vsub.f32 %v2608_v15, %v1757_v16 }
 0x38a   : > { %v2723_v20 = vpack.c.bf16 %v1757_v16, %v1754_v18  ;;  %v1842_v21 = vsub.f32 %v1743_v17, %v1754_v18 }
 0x38b   : > { %v1850_v22 = vand.u32 4294901760, %v1849_v19 }
 0x38c   : > { %v1843_v23 = vand.u32 4294901760, %v1842_v21  ;;  %2724 = vmatprep.subr.bf16.mxu1 %v2723_v20  ;;  %v2731_v24 = vpack.c.bf16 %v1849_v19, %v1842_v21 }
 0x38d   : > { %v1851_v25 = vsub.f32 %v1849_v19, %v1850_v22  ;;  %2726 = vmatpush3.bf16.msra.mxu1 %v2723_v20 }
 0x38e   : > { %v1844_v26 = vsub.f32 %v1842_v21, %v1843_v23  ;;  %v2739_v27 = vpack.c.bf16 %v1850_v22, %v1843_v23 }
 0x38f   : > { %v1852_v28 = vand.u32 4294901760, %v1851_v25 }
 0x390   : > { %v1845_v29 = vand.u32 4294901760, %v1844_v26  ;;  %2614 = vmatmul.mubr.f32.vlgmr.msra.gmra.mrb[2].mxu1 %v3290_v52 }
 0x391   : > { %2620 = vmatprep.mubr.f32.mxu1 %v3269_v32 }
 0x392   : > { %v2727_v9 = vpack.c.bf16 %v1852_v28, %v1845_v29 }
 0x394   : > { %2728 = vmatprep.subr.bf16.mxu1 %v2727_v9 }
 0x395   : > { %2730 = vmatpush3.bf16.msra.mxu1 %v2727_v9 }
 0x396   : > { %2732 = vmatprep.subr.bf16.mxu1 %v2731_v24 }
 0x398   : > { %2621 = vmatmul.mubr.f32.vlgmr.msra.gmra.mrb[2].mxu1 %v3280_v39 }
 0x399   : > { %2734 = vmatpush3.bf16.msra.mxu1 %v2731_v24  ;;  %2627 = vmatprep.mubr.f32.mxu1 %v3272_v33 }
 0x39a   : > { %2736 = vmatprep.subr.bf16.mxu1 %v2723_v20 }
 0x3a0   : > { %2628 = vmatmul.mubr.f32.vlgmr.msra.gmra.mrb[2].mxu1 %v3283_v40 }
 0x3a1   : > { %2738 = vmatpush3.bf16.msra.mxu1 %v2723_v20  ;;  %2634 = vmatprep.mubr.f32.mxu1 %v3275_v34 }
 0x3a2   : > { %2740 = vmatprep.subr.bf16.mxu1 %v2739_v27 }
 0x3a8   : > { %2635 = vmatmul.mubr.f32.vlgmr.msra.gmra.mrb[2].mxu1 %v3286_v41 }
 0x3a9   : > { %2742 = vmatpush3.bf16.msra.mxu1 %v2739_v27  ;;  %2641 = vmatprep.mubr.f32.mxu1 %v3269_v32 }
 0x3aa   : > { %2744 = vmatprep.subr.bf16.mxu1 %v2723_v20 }
 0x3b0   : > { %2642 = vmatmul.mubr.f32.vlgmr.msra.gmra.mrb[2].mxu1 %v3280_v39 }
 0x3b1   : > { %2746 = vmatpush3.bf16.msra.mxu1 %v2723_v20  ;;  %2648 = vmatprep.mubr.f32.mxu1 %v3269_v32 }
 0x3b8   : > { %2649 = vmatmul.mubr.f32.vlgmr.msra.gmra.mrb[2].mxu1 %v3280_v39 }
 0x48b   : > { %v2650_v30 = vpop.f32.mrb[2].mxu1 }
 0x48c   : > { %v2747_v31 = vadd.f32 1e-08, %v2650_v30  ;;  %v2245_v33 = vpop.f32.mrb[3].mxu1 }
 0x48d   : > { %v2748_v34 = vadd.f32 1e-08, %v2245_v33 }
 0x48e   : > { %2860 = vrsqrt.f32 %v2747_v31 }
 0x48f   : > { %2862 = vrsqrt.f32 %v2748_v34 }
 0x498   : > { %v2861_v35 = vpop.eup %2860 }
 0x499   : > { %v2863_v36 = vpop.eup %2862  ;;  %v2258_v37 = vmul.f32 %v2861_v35, %v3304_v61 }
 0x49a   : > { %v2257_v32 = vmul.f32 %v2863_v36, %v3307_v63 }
 0x49b   : > { %2260 = vst.msk [vmem:[%s217_s20 + $0x8] sm:$0xff] %vm224_vm0, %v2258_v37 }
 0x49c   : > { %2259 = vst.msk [vmem:[%s217_s20] sm:$0xff] %vm224_vm0, %v2257_v32 }
 0x49d   : > { %2963 = shalt.err (!%p2960_p7)
}
 0x49e   : > { %s2964_s10 = scalar_lea.hbm %s3342_s27, 256  ;;  %s2968_s26 = scalar_lea.hbm %s3393_s3, 1024 }
 0x49f   : > { %p2965_p9 = scmp.ne.s32.totalorder %s3342_s27, %s2964_s10  ;;  %p2969_p5 = scmp.lt.u32.totalorder %s3342_s27, %s3393_s3 }
 0x4a0   : > { %p2970_p10 = scmp.lt.u32.totalorder %s2968_s26, %s2964_s10  ;;  %p2972_p2 = scmp.lt.u32.totalorder %s2964_s10, %s3342_s27 }
 0x4a1   : > { %p2966_p12 = pnand %p2965_p9, %p3168_p6 }
 0x4a2   : > { %p2971_p1 = por %p2970_p10, %p2969_p5 }
 0x4a3   : > { %p2967_p0 = pneg %p2966_p12 }
 0x4a4   : > { %p2973_p4 = por %p2972_p2, %p2971_p1 }
 0x4a6   : > { %p2974_p8 = pnand %p2973_p4, %p2967_p0 }
 0x4a8   : > { %2977 = shalt.err (!%p2974_p8)
}
 0x4a9   : > { %s3028_s28 = smov 128   ;;  %s3029_s18 = smov 8  }
 0x4aa   : > { %2799 = dma.vmem_to_hbm [thread:$0]  (%p3168_p6), %s3344_s7, 256, %s3342_s27, %s2262_s16, %s3028_s28, %s3028_s28, %s3029_s18  }
 0x4ab PF: > { %p2821_p11 = scmp.ge.s32.totalorder %s3020_s15, 2  ;;  %s2290_s20 = sand.u32 1, %s3008_s12  }
 0x4ac   : > { %p3408_p13 = scmp.ne.s32.totalorder %s3398_s19, 0  ;;  %s2291_s8 = scalar_lea.sflag [#allocation4], %s2290_s20 }
 0x4ae   : > { %p2813_p3 = pnand %p2821_p11, %p3408_p13 }
 0x4b0   : > { %3003 = dma.done.wait (!%p2813_p3), %s2291_s8, 256  }
 0x4b1   : > { %3005 = vsyncadd (!%p2813_p3), %s2291_s8, 4294967040  ;;  %p17_p7 = scmp.ge.s32.totalorder %s3158_s23, 6   ;;  %s3409_s12 = smov %s3012_s13 }
 0x4b2   : > { %s3410_s13 = smov %s3016_s14  ;;  %s3411_s14 = smov %s3174_s9 }
 0x4b3   : > { %s3412_s15 = smov %s3158_s23  ;;  %19 = sbr.rel (!%p17_p7) target bundleno = 6 (0x6), region = 85 }
 0x4ba   :  { %2296 = vsyncpa [#allocation3], 1 }
 0x4bb   :  { %2298 = vsyncpa [#allocation3 + $0x1], 1 }
 0x4bc   :  { %2299 = vsyncpa [#allocation6], 1 }
 0x4bd   :  { %2300 = vsyncpa [#allocation4], 1 }
 0x4be   :  { %2302 = vsyncpa [#allocation4 + $0x1], 1 }

</bundles_post_ra>
